<compile_context>
chip_gen: v6e
topology: v6e:2x2x1
jax: 0.10.0
libtpu: 0.0.40
codegen_flags: <defaults>
</compile_context>

<pallas_src>
import jax
import jax.numpy as jnp
from jax import lax
from jax.experimental import pallas as pl
from jax.experimental.pallas import tpu as pltpu


def _round_up(a, b):
    return (a + b - 1) // b * b


def _gelu_exact(x):
    # PyTorch nn.GELU() default: exact erf-based GELU, computed in f32.
    return 0.5 * x * (1.0 + lax.erf(x * 0.7071067811865476))


# ----------------------------- kernels -----------------------------

def ffn_resident_kernel(x_ref, w1_ref, b1_ref, w2_ref, b2_ref, o_ref):
    """Whole FFN for one row tile; full W1/W2 stay resident in VMEM (constant index maps)."""
    h = jnp.dot(x_ref[...], w1_ref[...], preferred_element_type=jnp.float32)
    h = _gelu_exact(h + b1_ref[...].astype(jnp.float32))
    out = jnp.dot(h.astype(w2_ref.dtype), w2_ref[...],
                  preferred_element_type=jnp.float32)
    o_ref[...] = (out + b2_ref[...].astype(jnp.float32)).astype(o_ref.dtype)


def ffn_ktiled_kernel(x_ref, w1_ref, b1_ref, w2_ref, b2_ref, o_ref, acc_ref):
    """One (tm, d_model) row tile x one tk-slice of the hidden dim; f32 accumulator across k."""
    k = pl.program_id(1)

    # Initialize the f32 accumulator with the (hoisted) second bias on the first k step.
    @pl.when(k == 0)
    def _():
        acc_ref[...] = jnp.broadcast_to(b2_ref[...].astype(jnp.float32), acc_ref.shape)

    h = jnp.dot(x_ref[...], w1_ref[...], preferred_element_type=jnp.float32)   # (tm, tk) f32
    h = _gelu_exact(h + b1_ref[...].astype(jnp.float32))
    acc_ref[...] += jnp.dot(h.astype(w2_ref.dtype), w2_ref[...],
                            preferred_element_type=jnp.float32)                 # (tm, d_model)

    @pl.when(k == pl.num_programs(1) - 1)
    def _():
        o_ref[...] = acc_ref[...].astype(o_ref.dtype)


# ----------------------------- wrapper -----------------------------

def _vmem_budget_bytes():
    """Per-generation usable VMEM (leave ~16 MiB headroom for compiler scratch / misc)."""
    try:
        cap = int(pltpu.get_tpu_info().vmem_capacity_bytes)
    except Exception:
        cap = 64 << 20  # conservative fallback (v7x per-TC physical VMEM)
    return max(cap - (16 << 20), (cap * 3) // 4)


def feed_forward(x, w1, b1, w2, b2, *,
                 compute_dtype=jnp.bfloat16,
                 tm=None, tk=None,
                 vmem_budget_bytes=None,
                 force_ktiled=False):
    """GELU(x @ W1 + b1) @ W2 + b2   (Dropout(p=0.0) is the identity, elided).

    x : (..., d_model); w1: (d_model, d_mlp); b1: (d_mlp,); w2: (d_mlp, d_model); b2: (d_model,)
    """
    orig_shape = x.shape
    out_dtype = x.dtype
    d_model = orig_shape[-1]
    d_mlp = w1.shape[1]

    budget = int(vmem_budget_bytes if vmem_budget_bytes is not None else _vmem_budget_bytes())
    big_vmem = budget >= (80 << 20)               # v5e / v6e (128 MiB physical VMEM)

    bf = jnp.dtype(compute_dtype).itemsize        # bf16 -> 2
    of = jnp.dtype(out_dtype).itemsize
    row_align = max(8, 32 // bf, 32 // of)        # sublane packing multiple for x/out blocks

    # bf16 activations in the wrapper: halves x DMA + VMEM, removes per-step in-kernel casts.
    x2d = x.reshape(-1, d_model).astype(compute_dtype)
    M = x2d.shape[0]
    M_align = _round_up(max(M, 1), row_align)

    # Lane-dense feature padding (exact: zero pads hit zero weight rows/cols, GELU(0)=0).
    d_model_p = _round_up(d_model, 128)
    d_mlp_p = _round_up(d_mlp, 128)

    itm = lambda d: jnp.dtype(d).itemsize

    # ---------------- weight-resident fast path selection ----------------
    # (weights double-buffered by the default pipeline, but DMA'd once: constant index maps)
    weight_vmem = 2 * (d_model_p * d_mlp_p + d_mlp_p * d_model_p) * bf \
        + 2 * (d_mlp_p + d_model_p) * 4

    def fits_resident(tm_c):
        return (weight_vmem
                + 2 * tm_c * d_model_p * (bf + of)    # x / out double-buffered tiles
                + tm_c * d_mlp_p * (4 + bf)           # hidden intermediate (f32 + bf16 copy)
                ) <= budget

    tm_res = None
    if not force_ktiled:
        cands = [tm] if tm is not None else [1024, 768, 512, 384, 256, 128, 64, 32, 16]
        for cand in cands:
            tm_c = _round_up(min(cand, M_align), row_align)
            if fits_resident(tm_c):
                tm_res = tm_c
                break

    if tm_res is not None:
        # -------------------- weight-resident path --------------------
        tm_eff = tm_res
        M_pad = _round_up(M, tm_eff)
        x2d_p = jnp.pad(x2d, ((0, M_pad - M), (0, d_model_p - d_model)))
        w1c = jnp.pad(w1.astype(compute_dtype),
                      ((0, d_model_p - d_model), (0, d_mlp_p - d_mlp)))
        b1p = jnp.pad(b1.reshape(1, d_mlp).astype(jnp.float32),
                      ((0, 0), (0, d_mlp_p - d_mlp)))
        w2c = jnp.pad(w2.astype(compute_dtype),
                      ((0, d_mlp_p - d_mlp), (0, d_model_p - d_model)))
        b2p = jnp.pad(b2.reshape(1, d_model).astype(jnp.float32),
                      ((0, 0), (0, d_model_p - d_model)))

        grid = (M_pad // tm_eff,)
        cost = pl.CostEstimate(
            flops=int(4 * M * d_model * d_mlp),
            transcendentals=int(M * d_mlp),
            bytes_accessed=int(M_pad * d_model_p * bf + M_pad * d_model_p * of
                               + (w1c.size + w2c.size) * bf
                               + (b1p.size + b2p.size) * 4),
        )
        out = pl.pallas_call(
            ffn_resident_kernel,
            out_shape=jax.ShapeDtypeStruct((M_pad, d_model_p), out_dtype),
            grid_spec=pltpu.PrefetchScalarGridSpec(
                num_scalar_prefetch=0,
                grid=grid,
                in_specs=[
                    pl.BlockSpec((tm_eff, d_model_p), lambda i: (i, 0)),     # x rows (bf16)
                    pl.BlockSpec((d_model_p, d_mlp_p), lambda i: (0, 0)),    # full W1 (resident)
                    pl.BlockSpec((1, d_mlp_p), lambda i: (0, 0)),            # b1
                    pl.BlockSpec((d_mlp_p, d_model_p), lambda i: (0, 0)),    # full W2 (resident)
                    pl.BlockSpec((1, d_model_p), lambda i: (0, 0)),          # b2
                ],
                out_specs=pl.BlockSpec((tm_eff, d_model_p), lambda i: (i, 0)),
            ),
            compiler_params=pltpu.CompilerParams(
                dimension_semantics=("parallel",),
                vmem_limit_bytes=budget,
            ),
            cost_estimate=cost,
        )(x2d_p, w1c, b1p, w2c, b2p)
    else:
        # -------------------- k-tiled streaming path --------------------
        tm_pref = tm if tm is not None else (512 if big_vmem else 384)
        tk_pref = tk if tk is not None else (2048 if big_vmem else 512)

        def fits_ktiled(tm_c, tk_c):
            return (2 * (tm_c * d_model_p * bf        # x tile
                         + d_model_p * tk_c * bf      # W1 k-slice
                         + tk_c * 4                   # b1 k-slice
                         + tk_c * d_model_p * bf      # W2 k-slice
                         + d_model_p * 4              # b2
                         + tm_c * d_model_p * of)     # out tile
                    + tm_c * d_model_p * 4            # f32 accumulator scratch
                    + tm_c * tk_c * (4 + bf)          # hidden intermediate
                    ) <= budget

        tm_cands = ([tm] if tm is not None
                    else sorted({tm_pref, 1024, 512, 384, 256, 128, 64, 32, 16}, reverse=True))
        tk_cands = ([tk] if tk is not None
                    else sorted({tk_pref, 2048, 1024, 512, 256}, reverse=True))

        tm_eff = tk_eff = None
        for tm_c in tm_cands:
            tm_c = _round_up(min(tm_c, M_align), row_align)
            for tk_c in tk_cands:
                tk_c = min(_round_up(tk_c, 128), _round_up(d_mlp, 128))
                if fits_ktiled(tm_c, tk_c):
                    tm_eff, tk_eff = tm_c, tk_c
                    break
            if tm_eff is not None:
                break
        if tm_eff is None:  # last-resort minimum legal tiles
            tm_eff, tk_eff = row_align, 128

        d_mlp_kt = _round_up(d_mlp, tk_eff)
        M_pad = _round_up(M, tm_eff)

        x2d_p = jnp.pad(x2d, ((0, M_pad - M), (0, d_model_p - d_model)))
        w1c = jnp.pad(w1.astype(compute_dtype),
                      ((0, d_model_p - d_model), (0, d_mlp_kt - d_mlp)))
        b1p = jnp.pad(b1.reshape(1, d_mlp).astype(jnp.float32),
                      ((0, 0), (0, d_mlp_kt - d_mlp)))
        w2c = jnp.pad(w2.astype(compute_dtype),
                      ((0, d_mlp_kt - d_mlp), (0, d_model_p - d_model)))
        b2p = jnp.pad(b2.reshape(1, d_model).astype(jnp.float32),
                      ((0, 0), (0, d_model_p - d_model)))

        grid = (M_pad // tm_eff, d_mlp_kt // tk_eff)
        cost = pl.CostEstimate(
            flops=int(4 * M * d_model * d_mlp),
            transcendentals=int(M * d_mlp),
            bytes_accessed=int(M_pad * d_model_p * bf + M_pad * d_model_p * of
                               + grid[0] * (w1c.size + w2c.size) * bf
                               + grid[0] * (b1p.size + b2p.size) * 4),
        )
        out = pl.pallas_call(
            ffn_ktiled_kernel,
            out_shape=jax.ShapeDtypeStruct((M_pad, d_model_p), out_dtype),
            grid_spec=pltpu.PrefetchScalarGridSpec(
                num_scalar_prefetch=0,
                grid=grid,
                in_specs=[
                    pl.BlockSpec((tm_eff, d_model_p), lambda i, k: (i, 0)),   # x rows (bf16)
                    pl.BlockSpec((d_model_p, tk_eff), lambda i, k: (0, k)),   # W1 k-slice
                    pl.BlockSpec((1, tk_eff), lambda i, k: (0, k)),           # b1 k-slice
                    pl.BlockSpec((tk_eff, d_model_p), lambda i, k: (k, 0)),   # W2 k-slice
                    pl.BlockSpec((1, d_model_p), lambda i, k: (0, 0)),        # b2
                ],
                out_specs=pl.BlockSpec((tm_eff, d_model_p), lambda i, k: (i, 0)),
                scratch_shapes=[pltpu.VMEM((tm_eff, d_model_p), jnp.float32)],
            ),
            compiler_params=pltpu.CompilerParams(
                dimension_semantics=("parallel", "arbitrary"),
                vmem_limit_bytes=budget,
            ),
            cost_estimate=cost,
        )(x2d_p, w1c, b1p, w2c, b2p)

    out = out[:M, :d_model]
    return out.reshape(orig_shape)


if __name__ == "__main__":
    # Small shapes consistent with the module (scaled-down d_model/d_mlp).
    batch, seq, d_model, d_mlp = 2, 8, 128, 256

    key = jax.random.PRNGKey(0)
    kx, kw1, kb1, kw2, kb2 = jax.random.split(key, 5)

    x = jax.random.normal(kx, (batch, seq, d_model), dtype=jnp.float32)
    # Deterministic parameter init (synthetic; PyTorch-like uniform fan-in scale).
    lim1 = 1.0 / (d_model ** 0.5)
    lim2 = 1.0 / (d_mlp ** 0.5)
    w1 = jax.random.uniform(kw1, (d_model, d_mlp), jnp.float32, -lim1, lim1)
    b1 = jax.random.uniform(kb1, (d_mlp,), jnp.float32, -lim1, lim1)
    w2 = jax.random.uniform(kw2, (d_mlp, d_model), jnp.float32, -lim2, lim2)
    b2 = jax.random.uniform(kb2, (d_model,), jnp.float32, -lim2, lim2)

    # Path 1: weight-resident fast path (default for these sizes).
    out_res = jax.block_until_ready(feed_forward(x, w1, b1, w2, b2))
    # Path 2: k-tiled streaming path (forced, multi-step hidden reduction) to exercise both kernels.
    out_kt = jax.block_until_ready(
        feed_forward(x, w1, b1, w2, b2, force_ktiled=True, tm=16, tk=128))

    assert out_res.shape == x.shape and out_kt.shape == x.shape

    # Reference 1: identical bf16-operand / f32-accumulate semantics as the kernels (tight check).
    xb = x.reshape(-1, d_model).astype(jnp.bfloat16)
    h = jnp.dot(xb, w1.astype(jnp.bfloat16), preferred_element_type=jnp.float32) + b1
    h = _gelu_exact(h)
    ref_bf16 = (jnp.dot(h.astype(jnp.bfloat16), w2.astype(jnp.bfloat16),
                        preferred_element_type=jnp.float32) + b2).reshape(x.shape)
    assert jnp.allclose(out_res, ref_bf16, atol=2e-3, rtol=2e-3), "resident path vs bf16 ref"
    assert jnp.allclose(out_kt, ref_bf16, atol=2e-3, rtol=2e-3), "k-tiled path vs bf16 ref"

    # Reference 2: full-f32 PyTorch-equivalent forward (loose tolerance due to bf16 MXU operands).
    ref_f32 = jnp.dot(jax.nn.gelu(jnp.dot(x, w1) + b1, approximate=False), w2) + b2
    assert jnp.allclose(out_res, ref_f32, atol=5e-2, rtol=5e-2), "resident path vs f32 ref"
    assert jnp.allclose(out_kt, ref_f32, atol=5e-2, rtol=5e-2), "k-tiled path vs f32 ref"

    print("KERNEL_OK")
</pallas_src>

<mosaic_0001>
module attributes {stable_mosaic.version = 11 : i64} {
  func.func @ffn_resident_kernel(%arg0: i32, %arg1: memref<16x128xbf16, #tpu.memory_space<vmem>>, %arg2: memref<128x256xbf16, #tpu.memory_space<vmem>>, %arg3: memref<1x256xf32, #tpu.memory_space<vmem>>, %arg4: memref<256x128xbf16, #tpu.memory_space<vmem>>, %arg5: memref<1x128xf32, #tpu.memory_space<vmem>>, %arg6: memref<16x128xf32, #tpu.memory_space<vmem>>) attributes {dimension_semantics = [#tpu.dimension_semantics<parallel>], iteration_bounds = array<i64: 1>, scalar_prefetch = 0 : i64, scratch_operands = 0 : i64, tpu.core_type = #tpu.core_type<tc>, window_params = [{transform_indices = @transform_0, window_bounds = array<i64: 16, 128>}, {pipeline_mode = #tpu.pipeline_mode<synchronous>, transform_indices = @transform_1, window_bounds = array<i64: 128, 256>}, {pipeline_mode = #tpu.pipeline_mode<synchronous>, transform_indices = @transform_2, window_bounds = array<i64: 1, 256>}, {pipeline_mode = #tpu.pipeline_mode<synchronous>, transform_indices = @transform_3, window_bounds = array<i64: 256, 128>}, {pipeline_mode = #tpu.pipeline_mode<synchronous>, transform_indices = @transform_4, window_bounds = array<i64: 1, 128>}, {transform_indices = @transform_5, window_bounds = array<i64: 16, 128>}]} {
    %c0 = arith.constant 0 : index
    %c0_0 = arith.constant 0 : index
    %0 = vector.load %arg1[%c0, %c0_0] : memref<16x128xbf16, #tpu.memory_space<vmem>>, vector<16x128xbf16>
    %c0_1 = arith.constant 0 : index
    %c0_2 = arith.constant 0 : index
    %1 = vector.load %arg2[%c0_1, %c0_2] : memref<128x256xbf16, #tpu.memory_space<vmem>>, vector<128x256xbf16>
    %cst = arith.constant dense<0.000000e+00> : vector<16x256xf32>
    %2 = tpu.matmul %0, %1, %cst {dimension_numbers = #tpu.dot_dimension_numbers<[1], [0], [0], [1], [0, 0, 1, 1], [], []>} : vector<16x128xbf16>, vector<128x256xbf16>, vector<16x256xf32> -> vector<16x256xf32>
    %c0_3 = arith.constant 0 : index
    %c0_4 = arith.constant 0 : index
    %3 = vector.load %arg3[%c0_3, %c0_4] : memref<1x256xf32, #tpu.memory_space<vmem>>, vector<1x256xf32>
    %4 = vector.broadcast %3 : vector<1x256xf32> to vector<16x256xf32>
    %5 = arith.addf %2, %4 : vector<16x256xf32>
    %cst_5 = arith.constant 5.000000e-01 : f32
    %6 = vector.broadcast %cst_5 : f32 to vector<16x256xf32>
    %7 = arith.mulf %6, %5 : vector<16x256xf32>
    %cst_6 = arith.constant 0.707106769 : f32
    %8 = vector.broadcast %cst_6 : f32 to vector<16x256xf32>
    %9 = arith.mulf %5, %8 : vector<16x256xf32>
    %10 = math.erf %9 : vector<16x256xf32>
    %cst_7 = arith.constant 1.000000e+00 : f32
    %11 = vector.broadcast %cst_7 : f32 to vector<16x256xf32>
    %12 = arith.addf %11, %10 : vector<16x256xf32>
    %13 = arith.mulf %7, %12 : vector<16x256xf32>
    %14 = arith.truncf %13 : vector<16x256xf32> to vector<16x256xbf16>
    %c0_8 = arith.constant 0 : index
    %c0_9 = arith.constant 0 : index
    %15 = vector.load %arg4[%c0_8, %c0_9] : memref<256x128xbf16, #tpu.memory_space<vmem>>, vector<256x128xbf16>
    %cst_10 = arith.constant dense<0.000000e+00> : vector<16x128xf32>
    %16 = tpu.matmul %14, %15, %cst_10 {dimension_numbers = #tpu.dot_dimension_numbers<[1], [0], [0], [1], [0, 0, 1, 1], [], []>} : vector<16x256xbf16>, vector<256x128xbf16>, vector<16x128xf32> -> vector<16x128xf32>
    %c0_11 = arith.constant 0 : index
    %c0_12 = arith.constant 0 : index
    %17 = vector.load %arg5[%c0_11, %c0_12] : memref<1x128xf32, #tpu.memory_space<vmem>>, vector<1x128xf32>
    %18 = vector.broadcast %17 : vector<1x128xf32> to vector<16x128xf32>
    %19 = arith.addf %16, %18 : vector<16x128xf32>
    %c0_13 = arith.constant 0 : index
    %c0_14 = arith.constant 0 : index
    %20 = vector.load %arg6[%c0_13, %c0_14] : memref<16x128xf32, #tpu.memory_space<vmem>>, vector<16x128xf32>
    tpu.vector_store %arg6[%c0_13, %c0_14], %19 {strides = array<i32>} : memref<16x128xf32, #tpu.memory_space<vmem>>, vector<16x128xf32>,
    return
  }
  func.func @transform_0(%arg0: i32) -> (i32, i32) {
    %c0_i32 = arith.constant 0 : i32
    %c0_i32_0 = arith.constant 0 : i32
    return %arg0, %c0_i32 : i32, i32
  }
  func.func @transform_1(%arg0: i32) -> (i32, i32) {
    %c0_i32 = arith.constant 0 : i32
    %c0_i32_0 = arith.constant 0 : i32
    %c0_i32_1 = arith.constant 0 : i32
    return %c0_i32, %c0_i32_0 : i32, i32
  }
  func.func @transform_2(%arg0: i32) -> (i32, i32) {
    %c0_i32 = arith.constant 0 : i32
    %c0_i32_0 = arith.constant 0 : i32
    %c0_i32_1 = arith.constant 0 : i32
    return %c0_i32, %c0_i32_0 : i32, i32
  }
  func.func @transform_3(%arg0: i32) -> (i32, i32) {
    %c0_i32 = arith.constant 0 : i32
    %c0_i32_0 = arith.constant 0 : i32
    %c0_i32_1 = arith.constant 0 : i32
    return %c0_i32, %c0_i32_0 : i32, i32
  }
  func.func @transform_4(%arg0: i32) -> (i32, i32) {
    %c0_i32 = arith.constant 0 : i32
    %c0_i32_0 = arith.constant 0 : i32
    %c0_i32_1 = arith.constant 0 : i32
    return %c0_i32, %c0_i32_0 : i32, i32
  }
  func.func @transform_5(%arg0: i32) -> (i32, i32) {
    %c0_i32 = arith.constant 0 : i32
    %c0_i32_0 = arith.constant 0 : i32
    return %arg0, %c0_i32 : i32, i32
  }
}

</mosaic_0001>

<bundles_post_ra>
// kernel: tpu_custom_call.1
= control target key start
LH: loop header
LB: loop body
LE: loop exit
PB: predicated region body
PF: predicated region fallthrough
CT: control target
= control target key end

     0   :  { %10 = vsyncpa [#allocation3], 0  ;;  %s703_s0 = inlined_call_operand.hbm [shape: bf16[16,128], index: 0, kind: input, shape index: {}]   ;;  %s704_s1 = inlined_call_operand.hbm [shape: bf16[128,256], index: 1, kind: input, shape index: {}]   ;;  %s705_s2 = inlined_call_operand.vmem [shape: f32[1,256], index: 2, kind: input, shape index: {}]   ;;  %s706_s3 = inlined_call_operand.hbm [shape: bf16[256,128], index: 3, kind: input, shape index: {}]   ;;  %s707_s4 = inlined_call_operand.vmem [shape: f32[1,128], index: 4, kind: input, shape index: {}]   ;;  %s708_s5 = inlined_call_operand.hbm [shape: f32[16,128], index: 5, kind: output, shape index: {}]  }
   0x1   :  { %11 = vsyncpa [#allocation6], 0 }
   0x2   :  { %12 = vsyncpa [#allocation4], 0  ;;  %s640_s18 = smov [#allocation5]  }
   0x3   :  { %s30_s19 = sshll.u32 %s640_s18, 4  ;;  %s31_s19 = int_to_ptr.vmem [resolvable:$true] %s30_s19 }
   0x4   :  { %s562_s20 = scalar_lea.vmem %s31_s19, 2048  ;;  %p567_p1 = scmp.lt.s32.totalorder %s31_s19, %s31_s19 }
   0x5   :  { %p563_p0 = scmp.ne.s32.totalorder %s31_s19, %s562_s20  ;;  %p568_p2 = scmp.lt.s32.totalorder %s562_s20, %s562_s20 }
   0x7   :  { %p569_p3 = por %p568_p2, %p567_p1 }
   0x9   :  { %p570_p4 = pnand %p569_p3, %p563_p0 }
   0xb   :  { %573 = shalt.err (!%p570_p4)
}
   0xc   :  { %s641_s21 = smov 128   ;;  %s642_s22 = smov 8  }
   0xd   :  { %36 = dma.hbm_to_vmem [thread:$0]  %s704_s1, 2048, %s31_s19, [#allocation6], %s641_s21, %s641_s21, %s642_s22  }
   0xe   :  { %s643_s25 = smov [#allocation2]  }
   0xf   :  { %s18_s26 = sshll.u32 %s643_s25, 4  ;;  %s19_s26 = int_to_ptr.vmem [resolvable:$true] %s18_s26 }
  0x10   :  { %s582_s27 = scalar_lea.vmem %s19_s26, 128  ;;  %p587_p6 = scmp.lt.s32.totalorder %s19_s26, %s19_s26 }
  0x11   :  { %p583_p5 = scmp.ne.s32.totalorder %s19_s26, %s582_s27  ;;  %p588_p7 = scmp.lt.s32.totalorder %s582_s27, %s582_s27 }
  0x13   :  { %p589_p8 = por %p588_p7, %p587_p6 }
  0x15   :  { %p590_p9 = pnand %p589_p8, %p583_p5 }
  0x17   :  { %593 = shalt.err (!%p590_p9)
}
  0x18   :  { %s644_s28 = smov 64   ;;  %s645_s29 = smov 4  }
  0x19   :  { %24 = dma.hbm_to_vmem [thread:$0]  %s703_s0, 128, %s19_s26, [#allocation3], %s644_s28, %s644_s28, %s645_s29  }
  0x1a   :  { %s646_s7 = smov [#allocation7]  }
  0x1b   :  { %s44_s8 = sshll.u32 %s646_s7, 4  ;;  %s45_s8 = int_to_ptr.vmem [resolvable:$true] %s44_s8 }
  0x1c   :  { %s602_s1 = scalar_lea.vmem %s45_s8, 2048  ;;  %p607_p11 = scmp.lt.s32.totalorder %s45_s8, %s45_s8 }
  0x1d   :  { %p603_p10 = scmp.ne.s32.totalorder %s45_s8, %s602_s1  ;;  %p608_p12 = scmp.lt.s32.totalorder %s602_s1, %s602_s1 }
  0x1f   :  { %p609_p13 = por %p608_p12, %p607_p11 }
  0x21   :  { %p610_p0 = pnand %p609_p13, %p603_p10 }
  0x23   :  { %613 = shalt.err (!%p610_p0)
}
  0x24   :  { %50 = dma.hbm_to_vmem [thread:$0]  %s706_s3, 2048, %s45_s8, [#allocation6], %s644_s28, %s644_s28, %s645_s29  }
  0x25   :  { %634 = dma.done.wait [#allocation3], 128  }
  0x26   :  { %635 = vsyncadd [#allocation3], 4294967168 }
  0x27   :  { %636 = dma.done.wait [#allocation6], 4096  }
  0x28   :  { %637 = vsyncadd [#allocation6], 4294963200  ;;  %v647_v0 = vmov 0   ;;  %v505_v1 = vld [vmem:[#allocation5 + $0x74] ss:$8 sps:$4 sm:$0xff]   ;;  %v534_v22 = vld [vmem:[#allocation7 + $0x68] sm:$0xff]   ;;  %v83_v34 = vlaneseq }
  0x29   :  { %211 = vmatprep.mubr.bf16.mxu0 %v647_v0  ;;  %v507_v2 = vld [vmem:[#allocation5 + $0x70] ss:$8 sps:$4 sm:$0xff]   ;;  %179 = vmatprep.subr.bf16.mxu0 %v505_v1  ;;  %v508_v3 = vld [vmem:[#allocation5 + $0x64] ss:$8 sps:$4 sm:$0xff]   ;;  %v510_v4 = vld [vmem:[#allocation5 + $0x60] ss:$8 sps:$4 sm:$0xff]  }
  0x2a   :  { %180 = vmatpush1.bf16.msra.mxu0 %v507_v2  ;;  %v511_v5 = vld [vmem:[#allocation5 + $0x54] ss:$8 sps:$4 sm:$0xff]   ;;  %v513_v6 = vld [vmem:[#allocation5 + $0x50] ss:$8 sps:$4 sm:$0xff]   ;;  %v514_v7 = vld [vmem:[#allocation5 + $0x44] ss:$8 sps:$4 sm:$0xff]  }
  0x2b   :  { %181 = vmatprep.subr.bf16.mxu0 %v508_v3  ;;  %v516_v8 = vld [vmem:[#allocation5 + $0x40] ss:$8 sps:$4 sm:$0xff]   ;;  %v517_v9 = vld [vmem:[#allocation5 + $0x34] ss:$8 sps:$4 sm:$0xff]   ;;  %v519_v10 = vld [vmem:[#allocation5 + $0x30] ss:$8 sps:$4 sm:$0xff]  }
  0x2c   :  { %v520_v11 = vld [vmem:[#allocation5 + $0x24] ss:$8 sps:$4 sm:$0xff]   ;;  %v522_v12 = vld [vmem:[#allocation5 + $0x20] ss:$8 sps:$4 sm:$0xff]   ;;  %v523_v13 = vld [vmem:[#allocation5 + $0x14] ss:$8 sps:$4 sm:$0xff]  }
  0x2d   :  { %v525_v14 = vld [vmem:[#allocation5 + $0x10] ss:$8 sps:$4 sm:$0xff]   ;;  %v526_v15 = vld [vmem:[#allocation5 + $0x4] ss:$8 sps:$4 sm:$0xff]   ;;  %v528_v16 = vld [vmem:[#allocation5] ss:$8 sps:$4 sm:$0xff]  }
  0x2e   :  { %182 = vmatpush1.bf16.msra.mxu0 %v510_v4  ;;  %v529_v17 = vld [vmem:[#allocation2] sm:$0xff]   ;;  %v532_v20 = vld [vmem:[#allocation7 + $0x70] sm:$0xff]   ;;  %v535_v23 = vld [vmem:[#allocation7 + $0x28] sm:$0xff]   ;;  %v84_v35 = vshrl.u32 %v83_v34, 7  ;;  %s648_s12 = smov [#allocation8]  }
  0x2f   :  { %183 = vmatprep.subr.bf16.mxu0 %v511_v5  ;;  %v530_v18 = vld [vmem:[#allocation7 + $0x78] sm:$0xff]   ;;  %v533_v21 = vld [vmem:[#allocation7 + $0x30] sm:$0xff]   ;;  %v536_v24 = vld [vmem:[#allocation7 + $0x60] sm:$0xff]   ;;  %s427_s13 = sshll.u32 %s648_s12, 4  ;;  %s428_s13 = int_to_ptr.vmem [resolvable:$true] %s427_s13 }
  0x30   :  { %v531_v19 = vld [vmem:[#allocation7 + $0x38] sm:$0xff]   ;;  %474 = vmatprep.subr.bf16.mxu1 %v530_v18  ;;  %v537_v25 = vld [vmem:[#allocation7 + $0x20] sm:$0xff]   ;;  %v540_v28 = vld [vmem:[#allocation7 + $0x50] sm:$0xff]   ;;  %v85_v36 = vsub.s32 0, %v84_v35  ;;  %v89_v38 = vsub.s32 1, %v84_v35  ;;  %s614_s14 = scalar_lea.vmem %s428_s13, 256  ;;  %p619_p2 = scmp.lt.s32.totalorder %s428_s13, %s428_s13 }
  0x31   :  { %475 = vmatpush3.bf16.msra.mxu1 %v531_v19  ;;  %v538_v26 = vld [vmem:[#allocation7 + $0x58] sm:$0xff]   ;;  %v541_v29 = vld [vmem:[#allocation7 + $0x10] sm:$0xff]   ;;  %v542_v30 = vld [vmem:[#allocation7 + $0x48] sm:$0xff]   ;;  %p615_p1 = scmp.ne.s32.totalorder %s428_s13, %s614_s14  ;;  %p620_p3 = scmp.lt.s32.totalorder %s614_s14, %s614_s14 }
  0x32   :  { %184 = vmatpush1.bf16.msra.mxu0 %v513_v6  ;;  %476 = vmatprep.subr.bf16.mxu1 %v532_v20  ;;  %v539_v27 = vld [vmem:[#allocation7 + $0x18] sm:$0xff]   ;;  %v543_v31 = vld [vmem:[#allocation7 + $0x8] sm:$0xff]   ;;  %v544_v32 = vld [vmem:[#allocation7 + $0x40] sm:$0xff]  }
  0x33   :  { %185 = vmatprep.subr.bf16.mxu0 %v514_v7  ;;  %v545_v33 = vld [vmem:[#allocation7] sm:$0xff]   ;;  %v81_v37 = vld [vmem:[%s705_s2] sm:$0x3]  ;;  %p621_p4 = por %p620_p3, %p619_p2 }
  0x34   :  { %v86_v39 = vrot.slane %v81_v37, %v85_v36  ;;  %v90_v40 = vrot.slane %v81_v37, %v89_v38 }
  0x35   :  { %477 = vmatpush3.bf16.msra.mxu1 %v533_v21  ;;  %p622_p5 = pnand %p621_p4, %p615_p1 }
  0x36   :  { %186 = vmatpush1.bf16.msra.mxu0 %v516_v8  ;;  %478 = vmatprep.subr.bf16.mxu1 %v534_v22  ;;  %v457_v8 = vld [vmem:[%s707_s4] ss:$0 sm:$0xff] }
  0x37   :  { %187 = vmatprep.subr.bf16.mxu0 %v517_v9 }
  0x39   :  { %479 = vmatpush3.bf16.msra.mxu1 %v535_v23 }
  0x3a   :  { %188 = vmatpush1.bf16.msra.mxu0 %v519_v10  ;;  %480 = vmatprep.subr.bf16.mxu1 %v536_v24 }
  0x3b   :  { %189 = vmatprep.subr.bf16.mxu0 %v520_v11 }
  0x3d   :  { %481 = vmatpush3.bf16.msra.mxu1 %v537_v25 }
  0x3e   :  { %190 = vmatpush1.bf16.msra.mxu0 %v522_v12  ;;  %482 = vmatprep.subr.bf16.mxu1 %v538_v26 }
  0x3f   :  { %191 = vmatprep.subr.bf16.mxu0 %v523_v13 }
  0x41   :  { %483 = vmatpush3.bf16.msra.mxu1 %v539_v27 }
  0x42   :  { %192 = vmatpush1.bf16.msra.mxu0 %v525_v14  ;;  %484 = vmatprep.subr.bf16.mxu1 %v540_v28 }
  0x43   :  { %193 = vmatprep.subr.bf16.mxu0 %v526_v15 }
  0x45   :  { %485 = vmatpush3.bf16.msra.mxu1 %v541_v29 }
  0x46   :  { %194 = vmatpush1.bf16.msra.mxu0 %v528_v16  ;;  %486 = vmatprep.subr.bf16.mxu1 %v542_v30 }
  0x49   :  { %212 = vmatmul.mubr.bf16.vlgmr.msra.gmra.mxu0 %v529_v17  ;;  %487 = vmatpush3.bf16.msra.mxu1 %v543_v31 }
  0x4a   :  { %488 = vmatprep.subr.bf16.mxu1 %v544_v32 }
  0x4d   :  { %489 = vmatpush3.bf16.msra.mxu1 %v545_v33 }
 0x109   :  { %v213_v41 = vpop.f32.mrf.mxu0 }
 0x10a   :  { %v214_v42 = vadd.f32 %v213_v41, %v86_v39 }
 0x10b   :  { %v215_v43 = vpop.f32.mrf.mxu0 }
 0x10c   :  { %v216_v44 = vadd.f32 %v215_v43, %v90_v40  ;;  %v226_v45 = vmul.f32 0.70710677, %v214_v42  ;;  %v222_v0 = vmul.f32 0.5, %v214_v42 }
 0x10d   :  { %v217_v46 = vpop.f32.mrf.mxu0 }
 0x10e   :  { %v227_v47 = vmul.f32 0.70710677, %v216_v44  ;;  %v218_v48 = vadd.f32 %v217_v46, %v86_v39  ;;  %v223_v61 = vmul.f32 0.5, %v216_v44 }
 0x10f   :  { %v219_v49 = vpop.f32.mrf.mxu0 }
 0x110   :  { %546 = verf.f32 %v227_v47  ;;  %v228_v50 = vmul.f32 0.70710677, %v218_v48  ;;  %v220_v51 = vadd.f32 %v219_v49, %v90_v40  ;;  %v224_v60 = vmul.f32 0.5, %v218_v48 }
 0x111   :  { %548 = verf.f32 %v226_v45 }
 0x112   :  { %550 = verf.f32 %v228_v50  ;;  %v229_v52 = vmul.f32 0.70710677, %v220_v51  ;;  %v225_v62 = vmul.f32 0.5, %v220_v51 }
 0x114   :  { %552 = verf.f32 %v229_v52 }
 0x11d   :  { %v547_v53 = vpop.eup %546 }
 0x11e   :  { %v549_v54 = vpop.eup %548  ;;  %v235_v57 = vadd.f32 1.0, %v547_v53 }
 0x11f   :  { %v551_v55 = vpop.eup %550  ;;  %v234_v59 = vadd.f32 1.0, %v549_v54 }
 0x120   :  { %v236_v56 = vadd.f32 1.0, %v551_v55  ;;  %v239_v2 = vmul.f32 %v235_v57, %v223_v61 }
 0x121   :  { %v553_v58 = vpop.eup %552  ;;  %v238_v4 = vmul.f32 %v234_v59, %v222_v0 }
 0x122   :  { %v237_v63 = vadd.f32 1.0, %v553_v58  ;;  %v240_v1 = vmul.f32 %v236_v56, %v224_v60 }
 0x124   :  { %v241_v3 = vmul.f32 %v237_v63, %v225_v62  ;;  %v242_v6 = vpack.c.bf16 %v240_v1, %v238_v4 }
 0x126   :  { %v243_v5 = vpack.c.bf16 %v241_v3, %v239_v2 }
 0x128   :  { %411 = vmatprep.mubr.bf16.mxu1 %v243_v5 }
 0x129   :  { %412 = vmatmul.mubr.bf16.vlgmr.msra.gmra.mxu1 %v242_v6 }
 0x1e9   :  { %v490_v7 = vpop.f32.mrf.mxu1 }
 0x1eb   :  { %v491_v9 = vpop.f32.mrf.mxu1 }
 0x1ec   :  { %v492_v10 = vadd.f32 %v491_v9, %v490_v7 }
 0x1ed   :  { %v493_v11 = vpop.f32.mrf.mxu1 }
 0x1ee   :  { %v414_v12 = vadd.f32 %v492_v10, %v457_v8 }
 0x1ef   :  { %v494_v13 = vpop.f32.mrf.mxu1 }
 0x1f0   :  { %420 = vst [vmem:[#allocation8] sm:$0xff] %v414_v12  ;;  %v495_v14 = vadd.f32 %v494_v13, %v493_v11 }
 0x1f2   :  { %v417_v15 = vadd.f32 %v495_v14, %v457_v8 }
 0x1f4   :  { %421 = vst [vmem:[#allocation8 + $0x8] sm:$0xff] %v417_v15 }
 0x1f5   :  { %625 = shalt.err (!%p622_p5)
}
 0x1f6   :  { %433 = dma.vmem_to_hbm [thread:$0]  %s428_s13, 256, %s708_s5, [#allocation4], %s641_s21, %s641_s21, %s642_s22  }
 0x1f7   :  { %638 = dma.done.wait [#allocation4], 256  }
 0x1f8   :  { %639 = vsyncadd [#allocation4], 4294967040 }
 0x1f9   :  { %437 = vsyncpa [#allocation3], 1 }
 0x1fa   :  { %438 = vsyncpa [#allocation6], 1 }
 0x1fb   :  { %439 = vsyncpa [#allocation4], 1 }

</bundles_post_ra>
